<compile_context>
chip_gen: v5e
topology: v5e:2x2
jax: 0.10.0
libtpu: 0.0.40
codegen_flags: <defaults>
</compile_context>

<pallas_src>
import functools

import jax
import jax.numpy as jnp
from jax.experimental import pallas as pl
from jax.experimental.pallas import tpu as pltpu

LANE = 128      # TPU lane width: feature / output dims padded to this
SUBLANE = 8


def _round_up(x, m):
    return ((x + m - 1) // m) * m


# ----------------------------------------------------------------------------
# Pallas kernels: one RW_layer (max_step = 1, the RWPrompt default) with the
# gather, filter contraction, square-mean, eval-mode BatchNorm and ReLU fused.
# ----------------------------------------------------------------------------
def _selection_matrix(idxs, n_rows, n_nodes, B):
    """sel[a, i] = #{b : idxs[a, b] == i}  (the sub-graph gather as a matmul)."""
    iota = jax.lax.broadcasted_iota(jnp.int32, (n_rows, n_nodes), 1)
    sel = jnp.zeros((n_rows, n_nodes), jnp.float32)
    for b in range(B):                       # B = size_sub_graph, small, static
        sel = sel + (iota == idxs[:, b:b + 1]).astype(jnp.float32)
    return sel


def _rw_core(idxs_ref, x, zf_ref, red_ref, scale_ref, shift_ref, o_ref, *,
             inv_mb, B, n_nodes):
    # x        : [n_nodes, C]     node features (already projected if needed)
    # zf_ref   : [C, M*N]         graph-filter weights, flattened lane-dense
    # red_ref  : [M*N, N_pad]     0/1 m-group reduction (+ lane padding) matrix
    # scale/shift : [1, N_pad]    fused eval-mode BatchNorm (0 in padded lanes)
    # o_ref    : [tile_a, N_pad]  relu(BN(mean_{m,b} zx^2)), lane-dense store
    y = jnp.dot(x, zf_ref[...], preferred_element_type=jnp.float32)
    qm = jnp.dot(y * y, red_ref[...], preferred_element_type=jnp.float32)
    sel = _selection_matrix(idxs_ref[...], o_ref.shape[0], n_nodes, B)
    h = jnp.dot(sel, qm, preferred_element_type=jnp.float32) * inv_mb
    h = h * scale_ref[...] + shift_ref[...]
    o_ref[...] = jnp.maximum(h, 0.0)


def _rw_layer_kernel(idxs_ref, x_ref, zf_ref, red_ref, scale_ref, shift_ref,
                     o_ref, *, inv_mb, B, n_nodes):
    _rw_core(idxs_ref, x_ref[...], zf_ref, red_ref, scale_ref, shift_ref,
             o_ref, inv_mb=inv_mb, B=B, n_nodes=n_nodes)


def _rw_layer_kernel_proj(idxs_ref, x_ref, w_ref, b_ref, zf_ref, red_ref,
                          scale_ref, shift_ref, o_ref, *, inv_mb, B, n_nodes):
    # fc_in + ReLU fused in-kernel.  Node-side work is tiny and recomputed per
    # grid step so steps stay independent ("parallel" across v7x TensorCores).
    x = jnp.dot(x_ref[...], w_ref[...], preferred_element_type=jnp.float32)
    x = jnp.maximum(x + b_ref[...], 0.0)
    _rw_core(idxs_ref, x, zf_ref, red_ref, scale_ref, shift_ref, o_ref,
             inv_mb=inv_mb, B=B, n_nodes=n_nodes)


# ----------------------------------------------------------------------------
# Wrapper: one RW_layer + eval-BN + ReLU as a single pallas_call
# ----------------------------------------------------------------------------
def rw_layer_pallas(x_nodes, idxs, z, bn_scale, bn_shift, *,
                    w_in=None, b_in=None, n_pad=LANE, max_tile_a=512):
    """x_nodes: [n_nodes, Cx] node features; idxs: [A, B]; z: [M, C, N].
    Returns [A, n_pad] f32 (first N columns valid, rest exactly 0)."""
    n_nodes, cx = x_nodes.shape
    A, B = idxs.shape
    M, C, N = z.shape
    assert N <= n_pad
    f32 = jnp.float32

    # Pad node features: columns to a lane multiple (lane-dense DMA + aligned
    # contraction), rows to a sublane multiple.  Zero padding is exact.
    cx_p = _round_up(cx, LANE)
    nn_p = _round_up(n_nodes, SUBLANE)
    x_nodes = jnp.pad(x_nodes.astype(f32),
                      ((0, nn_p - n_nodes), (0, cx_p - cx)))

    if w_in is not None:
        w_in = jnp.pad(w_in.astype(f32), ((0, cx_p - cx), (0, 0)))
        b_in = b_in.reshape(1, -1).astype(f32)
        c_in = w_in.shape[1]            # contraction dim of the filter matmul
    else:
        c_in = cx_p

    # Graph-filter weights flattened lane-dense: z_flat[c, m*N + n] = z[m,c,n]
    z_flat = jnp.transpose(z.astype(f32), (1, 0, 2)).reshape(C, M * N)
    if c_in > C:
        z_flat = jnp.pad(z_flat, ((0, c_in - C), (0, 0)))
    # m-group reduction + lane padding: red[m*N + n, n] = 1
    red = (jnp.arange(M * N)[:, None] % N
           == jnp.arange(n_pad)[None, :]).astype(f32)
    scale_p = jnp.zeros((1, n_pad), f32).at[0, :N].set(bn_scale.astype(f32))
    shift_p = jnp.zeros((1, n_pad), f32).at[0, :N].set(bn_shift.astype(f32))

    # Large A-tiles amortize the ~0.35us/grid-step overhead; keep >= 2 steps so
    # both v7x TensorCores get work.  Ragged A handled by pad + slice (no
    # divisibility assert).  Working set is KBs, far below the 32 MiB scoped
    # VMEM default on v7x, so no explicit vmem_limit_bytes is needed.
    tile_a = max(SUBLANE, min(max_tile_a, pl.cdiv(A, 2)))
    tile_a = _round_up(tile_a, SUBLANE)
    grid = pl.cdiv(A, tile_a)
    a_pad = grid * tile_a
    idxs = idxs.astype(jnp.int32)
    if a_pad != A:
        idxs = jnp.pad(idxs, ((0, a_pad - A), (0, 0)))   # pad rows -> node 0

    in_specs = [pl.BlockSpec((tile_a, B), lambda i: (i, 0)),    # idxs tile
                pl.BlockSpec((nn_p, cx_p), lambda i: (0, 0))]   # node features
    args = [idxs, x_nodes]
    if w_in is not None:
        in_specs += [pl.BlockSpec(w_in.shape, lambda i: (0, 0)),
                     pl.BlockSpec(b_in.shape, lambda i: (0, 0))]
        args += [w_in, b_in]
        kernel = _rw_layer_kernel_proj
    else:
        kernel = _rw_layer_kernel
    in_specs += [pl.BlockSpec((c_in, M * N), lambda i: (0, 0)),
                 pl.BlockSpec((M * N, n_pad), lambda i: (0, 0)),
                 pl.BlockSpec((1, n_pad), lambda i: (0, 0)),
                 pl.BlockSpec((1, n_pad), lambda i: (0, 0))]
    args += [z_flat, red, scale_p, shift_p]

    kernel = functools.partial(kernel, inv_mb=1.0 / (M * B), B=B, n_nodes=nn_p)
    out = pl.pallas_call(
        kernel,
        out_shape=jax.ShapeDtypeStruct((a_pad, n_pad), f32),
        grid_spec=pltpu.PrefetchScalarGridSpec(
            num_scalar_prefetch=0,
            grid=(grid,),
            in_specs=in_specs,
            out_specs=pl.BlockSpec((tile_a, n_pad), lambda i: (i, 0)),
        ),
        compiler_params=pltpu.CompilerParams(
            dimension_semantics=("parallel",)),
    )(*args)
    return out[:A] if a_pad != A else out


# ----------------------------------------------------------------------------
# RWPrompt forward (RW layers in Pallas, tiny readout glue in plain JAX)
# ----------------------------------------------------------------------------
def rw_prompt_forward(params, adj, features, pretrain_emb, idxs, *,
                      size_sub_graph):
    del adj  # unused when max_step == 1 (the RWPrompt default)
    # TODO(synk): max_step > 1 would add the adjacency-propagation branch
    # (x <- adj @ x, z <- adj_hidden_norm contraction); not exercised here.
    n0 = params["z0"].shape[-1]
    n1 = params["z1"].shape[-1]

    # layer 0: fc_in + ReLU, RW filter contraction, gather-mean, BN, ReLU
    h0 = rw_layer_pallas(features, idxs, params["z0"],
                         params["bn0_scale"], params["bn0_shift"],
                         w_in=params["w_in"].T, b_in=params["b_in"])
    # layer 1 consumes the lane-padded h0 slab directly (padding columns are 0)
    h1 = rw_layer_pallas(h0, idxs, params["z1"],
                         params["bn1_scale"], params["bn1_shift"])

    # readout: per-graph mean pooling, concat with pretrain emb, linear head.
    # TODO(synk): the pooling + head could also be folded into the layer-1
    # kernel; left in XLA since it is a handful of tiny ops.
    G = h0.shape[0] // size_sub_graph
    g0 = jnp.mean(h0[:, :n0].reshape(G, size_sub_graph, n0), axis=1)
    g1 = jnp.mean(h1[:, :n1].reshape(G, size_sub_graph, n1), axis=1)
    out = jnp.concatenate([g0, g1, pretrain_emb], axis=1)
    return out @ params["w_pred"].T + params["b_pred"]


# ----------------------------------------------------------------------------
# Deterministic parameter / input construction and smoke test
# ----------------------------------------------------------------------------
if __name__ == "__main__":
    key = jax.random.PRNGKey(0)

    # small shapes consistent with the module
    feature_dim = 12
    hidden_dims = [16, 32, 16]           # num_layers = 2
    size_graph_filter = [8, 8]
    size_sub_graph = 8
    pretrain_dim = 24
    output_dim = 1
    num_graphs = 4
    A = num_graphs * size_sub_graph      # rows of idxs (graphs * sub-graph size)
    n_nodes = A

    ks = jax.random.split(key, 20)
    eps = 1e-5

    # BatchNorm (eval mode) parameters -> fused scale/shift
    g0 = 1.0 + 0.1 * jax.random.normal(ks[4], (hidden_dims[1],), jnp.float32)
    b0 = 0.05 * jax.random.normal(ks[5], (hidden_dims[1],), jnp.float32)
    m0 = 0.1 * jax.random.normal(ks[6], (hidden_dims[1],), jnp.float32)
    v0 = 1.0 + 0.2 * jax.random.uniform(ks[7], (hidden_dims[1],), jnp.float32)
    g1 = 1.0 + 0.1 * jax.random.normal(ks[8], (hidden_dims[2],), jnp.float32)
    b1 = 0.05 * jax.random.normal(ks[9], (hidden_dims[2],), jnp.float32)
    m1 = 0.1 * jax.random.normal(ks[10], (hidden_dims[2],), jnp.float32)
    v1 = 1.0 + 0.2 * jax.random.uniform(ks[11], (hidden_dims[2],), jnp.float32)
    bn0_scale = g0 / jnp.sqrt(v0 + eps)
    bn1_scale = g1 / jnp.sqrt(v1 + eps)

    params = {
        # RW_layer 0 (feature_dim -> 32, hidden_dim = 16)
        "w_in": 0.2 * jax.random.normal(ks[0], (hidden_dims[0], feature_dim),
                                        jnp.float32),
        "b_in": 0.1 * jax.random.normal(ks[1], (hidden_dims[0],), jnp.float32),
        "z0": jax.random.uniform(
            ks[2], (size_graph_filter[0], hidden_dims[0], hidden_dims[1]),
            jnp.float32),                       # features_hidden ~ U(0,1)
        # RW_layer 1 (32 -> 16, no hidden_dim)
        "z1": jax.random.uniform(
            ks[3], (size_graph_filter[1], hidden_dims[1], hidden_dims[2]),
            jnp.float32),
        # fused eval-mode BatchNorm params
        "bn0_scale": bn0_scale,
        "bn0_shift": b0 - m0 * bn0_scale,
        "bn1_scale": bn1_scale,
        "bn1_shift": b1 - m1 * bn1_scale,
        # linear_prediction: [output_dim, sum(hidden_dims[1:]) + pretrain_dim]
        "w_pred": 0.1 * jax.random.normal(
            ks[12], (output_dim, sum(hidden_dims[1:]) + pretrain_dim),
            jnp.float32),
        "b_pred": 0.1 * jax.random.normal(ks[13], (output_dim,), jnp.float32),
    }

    # inputs
    features = jax.random.normal(ks[14], (n_nodes, feature_dim), jnp.float32)
    idxs = jax.random.randint(ks[15], (A, size_sub_graph), 0, n_nodes)
    adj_raw = jax.random.uniform(ks[16], (A, size_sub_graph, size_sub_graph),
                                 jnp.float32)
    adj = 0.5 * (adj_raw + jnp.swapaxes(adj_raw, 1, 2))   # symmetric (unused, max_step=1)
    pretrain_emb = jax.random.normal(ks[17], (num_graphs, pretrain_dim),
                                     jnp.float32)

    fwd = jax.jit(functools.partial(rw_prompt_forward,
                                    size_sub_graph=size_sub_graph))
    out = fwd(params, adj, features, pretrain_emb, idxs)
    jax.block_until_ready(out)
    assert out.shape == (num_graphs, output_dim)
    assert bool(jnp.all(jnp.isfinite(out)))
    print("KERNEL_OK")
</pallas_src>

<mosaic_0001>
module attributes {stable_mosaic.version = 11 : i64} {
  func.func @_rw_layer_kernel_proj(%arg0: i32, %arg1: memref<16x8xi32, #tpu.memory_space<vmem>>, %arg2: memref<32x128xf32, #tpu.memory_space<vmem>>, %arg3: memref<128x16xf32, #tpu.memory_space<vmem>>, %arg4: memref<1x16xf32, #tpu.memory_space<vmem>>, %arg5: memref<16x256xf32, #tpu.memory_space<vmem>>, %arg6: memref<256x128xf32, #tpu.memory_space<vmem>>, %arg7: memref<1x128xf32, #tpu.memory_space<vmem>>, %arg8: memref<1x128xf32, #tpu.memory_space<vmem>>, %arg9: memref<16x128xf32, #tpu.memory_space<vmem>>) attributes {dimension_semantics = [#tpu.dimension_semantics<parallel>], iteration_bounds = array<i64: 2>, scalar_prefetch = 0 : i64, scratch_operands = 0 : i64, tpu.core_type = #tpu.core_type<tc>, window_params = [{transform_indices = @transform_0, window_bounds = array<i64: 16, 8>}, {pipeline_mode = #tpu.pipeline_mode<synchronous>, transform_indices = @transform_1, window_bounds = array<i64: 32, 128>}, {pipeline_mode = #tpu.pipeline_mode<synchronous>, transform_indices = @transform_2, window_bounds = array<i64: 128, 16>}, {pipeline_mode = #tpu.pipeline_mode<synchronous>, transform_indices = @transform_3, window_bounds = array<i64: 1, 16>}, {pipeline_mode = #tpu.pipeline_mode<synchronous>, transform_indices = @transform_4, window_bounds = array<i64: 16, 256>}, {pipeline_mode = #tpu.pipeline_mode<synchronous>, transform_indices = @transform_5, window_bounds = array<i64: 256, 128>}, {pipeline_mode = #tpu.pipeline_mode<synchronous>, transform_indices = @transform_6, window_bounds = array<i64: 1, 128>}, {pipeline_mode = #tpu.pipeline_mode<synchronous>, transform_indices = @transform_7, window_bounds = array<i64: 1, 128>}, {transform_indices = @transform_8, window_bounds = array<i64: 16, 128>}]} {
    %c0 = arith.constant 0 : index
    %c0_0 = arith.constant 0 : index
    %0 = vector.load %arg2[%c0, %c0_0] : memref<32x128xf32, #tpu.memory_space<vmem>>, vector<32x128xf32>
    %c0_1 = arith.constant 0 : index
    %c0_2 = arith.constant 0 : index
    %1 = vector.load %arg3[%c0_1, %c0_2] : memref<128x16xf32, #tpu.memory_space<vmem>>, vector<128x16xf32>
    %cst = arith.constant dense<0.000000e+00> : vector<32x16xf32>
    %2 = tpu.matmul %0, %1, %cst {dimension_numbers = #tpu.dot_dimension_numbers<[1], [0], [0], [1], [0, 0, 1, 1], [], []>} : vector<32x128xf32>, vector<128x16xf32>, vector<32x16xf32> -> vector<32x16xf32>
    %c0_3 = arith.constant 0 : index
    %c0_4 = arith.constant 0 : index
    %3 = vector.load %arg4[%c0_3, %c0_4] : memref<1x16xf32, #tpu.memory_space<vmem>>, vector<1x16xf32>
    %4 = vector.broadcast %3 : vector<1x16xf32> to vector<32x16xf32>
    %5 = arith.addf %2, %4 : vector<32x16xf32>
    %cst_5 = arith.constant 0.000000e+00 : f32
    %6 = vector.broadcast %cst_5 : f32 to vector<32x16xf32>
    %7 = arith.maximumf %5, %6 : vector<32x16xf32>
    %c0_6 = arith.constant 0 : index
    %c0_7 = arith.constant 0 : index
    %8 = vector.load %arg5[%c0_6, %c0_7] : memref<16x256xf32, #tpu.memory_space<vmem>>, vector<16x256xf32>
    %cst_8 = arith.constant dense<0.000000e+00> : vector<32x256xf32>
    %9 = tpu.matmul %7, %8, %cst_8 {dimension_numbers = #tpu.dot_dimension_numbers<[1], [0], [0], [1], [0, 0, 1, 1], [], []>} : vector<32x16xf32>, vector<16x256xf32>, vector<32x256xf32> -> vector<32x256xf32>
    %10 = arith.mulf %9, %9 : vector<32x256xf32>
    %c0_9 = arith.constant 0 : index
    %c0_10 = arith.constant 0 : index
    %11 = vector.load %arg6[%c0_9, %c0_10] : memref<256x128xf32, #tpu.memory_space<vmem>>, vector<256x128xf32>
    %cst_11 = arith.constant dense<0.000000e+00> : vector<32x128xf32>
    %12 = tpu.matmul %10, %11, %cst_11 {dimension_numbers = #tpu.dot_dimension_numbers<[1], [0], [0], [1], [0, 0, 1, 1], [], []>} : vector<32x256xf32>, vector<256x128xf32>, vector<32x128xf32> -> vector<32x128xf32>
    %c0_12 = arith.constant 0 : index
    %c0_13 = arith.constant 0 : index
    %13 = vector.load %arg1[%c0_12, %c0_13] : memref<16x8xi32, #tpu.memory_space<vmem>>, vector<16x8xi32>
    %14 = tpu.iota {dimensions = array<i32: 1>} : vector<16x32xi32>
    %cst_14 = arith.constant 0.000000e+00 : f32
    %15 = vector.broadcast %cst_14 : f32 to vector<16x32xf32>
    %16 = vector.extract_strided_slice %13 {offsets = [0, 0], sizes = [16, 1], strides = [1, 1]} : vector<16x8xi32> to vector<16x1xi32>
    %17 = vector.broadcast %16 : vector<16x1xi32> to vector<16x32xi32>
    %18 = arith.cmpi eq, %14, %17 : vector<16x32xi32>
    %19 = arith.extui %18 : vector<16x32xi1> to vector<16x32xi32>
    %20 = arith.sitofp %19 : vector<16x32xi32> to vector<16x32xf32>
    %21 = arith.addf %15, %20 : vector<16x32xf32>
    %22 = vector.extract_strided_slice %13 {offsets = [0, 1], sizes = [16, 1], strides = [1, 1]} : vector<16x8xi32> to vector<16x1xi32>
    %23 = vector.broadcast %22 : vector<16x1xi32> to vector<16x32xi32>
    %24 = arith.cmpi eq, %14, %23 : vector<16x32xi32>
    %25 = arith.extui %24 : vector<16x32xi1> to vector<16x32xi32>
    %26 = arith.sitofp %25 : vector<16x32xi32> to vector<16x32xf32>
    %27 = arith.addf %21, %26 : vector<16x32xf32>
    %28 = vector.extract_strided_slice %13 {offsets = [0, 2], sizes = [16, 1], strides = [1, 1]} : vector<16x8xi32> to vector<16x1xi32>
    %29 = vector.broadcast %28 : vector<16x1xi32> to vector<16x32xi32>
    %30 = arith.cmpi eq, %14, %29 : vector<16x32xi32>
    %31 = arith.extui %30 : vector<16x32xi1> to vector<16x32xi32>
    %32 = arith.sitofp %31 : vector<16x32xi32> to vector<16x32xf32>
    %33 = arith.addf %27, %32 : vector<16x32xf32>
    %34 = vector.extract_strided_slice %13 {offsets = [0, 3], sizes = [16, 1], strides = [1, 1]} : vector<16x8xi32> to vector<16x1xi32>
    %35 = vector.broadcast %34 : vector<16x1xi32> to vector<16x32xi32>
    %36 = arith.cmpi eq, %14, %35 : vector<16x32xi32>
    %37 = arith.extui %36 : vector<16x32xi1> to vector<16x32xi32>
    %38 = arith.sitofp %37 : vector<16x32xi32> to vector<16x32xf32>
    %39 = arith.addf %33, %38 : vector<16x32xf32>
    %40 = vector.extract_strided_slice %13 {offsets = [0, 4], sizes = [16, 1], strides = [1, 1]} : vector<16x8xi32> to vector<16x1xi32>
    %41 = vector.broadcast %40 : vector<16x1xi32> to vector<16x32xi32>
    %42 = arith.cmpi eq, %14, %41 : vector<16x32xi32>
    %43 = arith.extui %42 : vector<16x32xi1> to vector<16x32xi32>
    %44 = arith.sitofp %43 : vector<16x32xi32> to vector<16x32xf32>
    %45 = arith.addf %39, %44 : vector<16x32xf32>
    %46 = vector.extract_strided_slice %13 {offsets = [0, 5], sizes = [16, 1], strides = [1, 1]} : vector<16x8xi32> to vector<16x1xi32>
    %47 = vector.broadcast %46 : vector<16x1xi32> to vector<16x32xi32>
    %48 = arith.cmpi eq, %14, %47 : vector<16x32xi32>
    %49 = arith.extui %48 : vector<16x32xi1> to vector<16x32xi32>
    %50 = arith.sitofp %49 : vector<16x32xi32> to vector<16x32xf32>
    %51 = arith.addf %45, %50 : vector<16x32xf32>
    %52 = vector.extract_strided_slice %13 {offsets = [0, 6], sizes = [16, 1], strides = [1, 1]} : vector<16x8xi32> to vector<16x1xi32>
    %53 = vector.broadcast %52 : vector<16x1xi32> to vector<16x32xi32>
    %54 = arith.cmpi eq, %14, %53 : vector<16x32xi32>
    %55 = arith.extui %54 : vector<16x32xi1> to vector<16x32xi32>
    %56 = arith.sitofp %55 : vector<16x32xi32> to vector<16x32xf32>
    %57 = arith.addf %51, %56 : vector<16x32xf32>
    %58 = vector.extract_strided_slice %13 {offsets = [0, 7], sizes = [16, 1], strides = [1, 1]} : vector<16x8xi32> to vector<16x1xi32>
    %59 = vector.broadcast %58 : vector<16x1xi32> to vector<16x32xi32>
    %60 = arith.cmpi eq, %14, %59 : vector<16x32xi32>
    %61 = arith.extui %60 : vector<16x32xi1> to vector<16x32xi32>
    %62 = arith.sitofp %61 : vector<16x32xi32> to vector<16x32xf32>
    %63 = arith.addf %57, %62 : vector<16x32xf32>
    %cst_15 = arith.constant dense<0.000000e+00> : vector<16x128xf32>
    %64 = tpu.matmul %63, %12, %cst_15 {dimension_numbers = #tpu.dot_dimension_numbers<[1], [0], [0], [1], [0, 0, 1, 1], [], []>} : vector<16x32xf32>, vector<32x128xf32>, vector<16x128xf32> -> vector<16x128xf32>
    %cst_16 = arith.constant 1.562500e-02 : f32
    %65 = vector.broadcast %cst_16 : f32 to vector<16x128xf32>
    %66 = arith.mulf %64, %65 : vector<16x128xf32>
    %c0_17 = arith.constant 0 : index
    %c0_18 = arith.constant 0 : index
    %67 = vector.load %arg7[%c0_17, %c0_18] : memref<1x128xf32, #tpu.memory_space<vmem>>, vector<1x128xf32>
    %68 = vector.broadcast %67 : vector<1x128xf32> to vector<16x128xf32>
    %69 = arith.mulf %66, %68 : vector<16x128xf32>
    %c0_19 = arith.constant 0 : index
    %c0_20 = arith.constant 0 : index
    %70 = vector.load %arg8[%c0_19, %c0_20] : memref<1x128xf32, #tpu.memory_space<vmem>>, vector<1x128xf32>
    %71 = vector.broadcast %70 : vector<1x128xf32> to vector<16x128xf32>
    %72 = arith.addf %69, %71 : vector<16x128xf32>
    %cst_21 = arith.constant 0.000000e+00 : f32
    %73 = vector.broadcast %cst_21 : f32 to vector<16x128xf32>
    %74 = arith.maximumf %72, %73 : vector<16x128xf32>
    %c0_22 = arith.constant 0 : index
    %c0_23 = arith.constant 0 : index
    %75 = vector.load %arg9[%c0_22, %c0_23] : memref<16x128xf32, #tpu.memory_space<vmem>>, vector<16x128xf32>
    tpu.vector_store %arg9[%c0_22, %c0_23], %74 {strides = array<i32>} : memref<16x128xf32, #tpu.memory_space<vmem>>, vector<16x128xf32>,
    return
  }
  func.func @transform_0(%arg0: i32) -> (i32, i32) {
    %c0_i32 = arith.constant 0 : i32
    %c0_i32_0 = arith.constant 0 : i32
    return %arg0, %c0_i32 : i32, i32
  }
  func.func @transform_1(%arg0: i32) -> (i32, i32) {
    %c0_i32 = arith.constant 0 : i32
    %c0_i32_0 = arith.constant 0 : i32
    %c0_i32_1 = arith.constant 0 : i32
    return %c0_i32, %c0_i32_0 : i32, i32
  }
  func.func @transform_2(%arg0: i32) -> (i32, i32) {
    %c0_i32 = arith.constant 0 : i32
    %c0_i32_0 = arith.constant 0 : i32
    %c0_i32_1 = arith.constant 0 : i32
    return %c0_i32, %c0_i32_0 : i32, i32
  }
  func.func @transform_3(%arg0: i32) -> (i32, i32) {
    %c0_i32 = arith.constant 0 : i32
    %c0_i32_0 = arith.constant 0 : i32
    %c0_i32_1 = arith.constant 0 : i32
    return %c0_i32, %c0_i32_0 : i32, i32
  }
  func.func @transform_4(%arg0: i32) -> (i32, i32) {
    %c0_i32 = arith.constant 0 : i32
    %c0_i32_0 = arith.constant 0 : i32
    %c0_i32_1 = arith.constant 0 : i32
    return %c0_i32, %c0_i32_0 : i32, i32
  }
  func.func @transform_5(%arg0: i32) -> (i32, i32) {
    %c0_i32 = arith.constant 0 : i32
    %c0_i32_0 = arith.constant 0 : i32
    %c0_i32_1 = arith.constant 0 : i32
    return %c0_i32, %c0_i32_0 : i32, i32
  }
  func.func @transform_6(%arg0: i32) -> (i32, i32) {
    %c0_i32 = arith.constant 0 : i32
    %c0_i32_0 = arith.constant 0 : i32
    %c0_i32_1 = arith.constant 0 : i32
    return %c0_i32, %c0_i32_0 : i32, i32
  }
  func.func @transform_7(%arg0: i32) -> (i32, i32) {
    %c0_i32 = arith.constant 0 : i32
    %c0_i32_0 = arith.constant 0 : i32
    %c0_i32_1 = arith.constant 0 : i32
    return %c0_i32, %c0_i32_0 : i32, i32
  }
  func.func @transform_8(%arg0: i32) -> (i32, i32) {
    %c0_i32 = arith.constant 0 : i32
    %c0_i32_0 = arith.constant 0 : i32
    return %arg0, %c0_i32 : i32, i32
  }
}

module attributes {stable_mosaic.version = 11 : i64} {
  func.func @_rw_layer_kernel(%arg0: i32, %arg1: memref<16x8xi32, #tpu.memory_space<vmem>>, %arg2: memref<32x128xf32, #tpu.memory_space<vmem>>, %arg3: memref<128x128xf32, #tpu.memory_space<vmem>>, %arg4: memref<128x128xf32, #tpu.memory_space<vmem>>, %arg5: memref<1x128xf32, #tpu.memory_space<vmem>>, %arg6: memref<1x128xf32, #tpu.memory_space<vmem>>, %arg7: memref<16x128xf32, #tpu.memory_space<vmem>>) attributes {dimension_semantics = [#tpu.dimension_semantics<parallel>], iteration_bounds = array<i64: 2>, scalar_prefetch = 0 : i64, scratch_operands = 0 : i64, tpu.core_type = #tpu.core_type<tc>, window_params = [{transform_indices = @transform_0, window_bounds = array<i64: 16, 8>}, {pipeline_mode = #tpu.pipeline_mode<synchronous>, transform_indices = @transform_1, window_bounds = array<i64: 32, 128>}, {pipeline_mode = #tpu.pipeline_mode<synchronous>, transform_indices = @transform_2, window_bounds = array<i64: 128, 128>}, {pipeline_mode = #tpu.pipeline_mode<synchronous>, transform_indices = @transform_3, window_bounds = array<i64: 128, 128>}, {pipeline_mode = #tpu.pipeline_mode<synchronous>, transform_indices = @transform_4, window_bounds = array<i64: 1, 128>}, {pipeline_mode = #tpu.pipeline_mode<synchronous>, transform_indices = @transform_5, window_bounds = array<i64: 1, 128>}, {transform_indices = @transform_6, window_bounds = array<i64: 16, 128>}]} {
    %c0 = arith.constant 0 : index
    %c0_0 = arith.constant 0 : index
    %0 = vector.load %arg2[%c0, %c0_0] : memref<32x128xf32, #tpu.memory_space<vmem>>, vector<32x128xf32>
    %c0_1 = arith.constant 0 : index
    %c0_2 = arith.constant 0 : index
    %1 = vector.load %arg3[%c0_1, %c0_2] : memref<128x128xf32, #tpu.memory_space<vmem>>, vector<128x128xf32>
    %cst = arith.constant dense<0.000000e+00> : vector<32x128xf32>
    %2 = tpu.matmul %0, %1, %cst {dimension_numbers = #tpu.dot_dimension_numbers<[1], [0], [0], [1], [0, 0, 1, 1], [], []>} : vector<32x128xf32>, vector<128x128xf32>, vector<32x128xf32> -> vector<32x128xf32>
    %3 = arith.mulf %2, %2 : vector<32x128xf32>
    %c0_3 = arith.constant 0 : index
    %c0_4 = arith.constant 0 : index
    %4 = vector.load %arg4[%c0_3, %c0_4] : memref<128x128xf32, #tpu.memory_space<vmem>>, vector<128x128xf32>
    %cst_5 = arith.constant dense<0.000000e+00> : vector<32x128xf32>
    %5 = tpu.matmul %3, %4, %cst_5 {dimension_numbers = #tpu.dot_dimension_numbers<[1], [0], [0], [1], [0, 0, 1, 1], [], []>} : vector<32x128xf32>, vector<128x128xf32>, vector<32x128xf32> -> vector<32x128xf32>
    %c0_6 = arith.constant 0 : index
    %c0_7 = arith.constant 0 : index
    %6 = vector.load %arg1[%c0_6, %c0_7] : memref<16x8xi32, #tpu.memory_space<vmem>>, vector<16x8xi32>
    %7 = tpu.iota {dimensions = array<i32: 1>} : vector<16x32xi32>
    %cst_8 = arith.constant 0.000000e+00 : f32
    %8 = vector.broadcast %cst_8 : f32 to vector<16x32xf32>
    %9 = vector.extract_strided_slice %6 {offsets = [0, 0], sizes = [16, 1], strides = [1, 1]} : vector<16x8xi32> to vector<16x1xi32>
    %10 = vector.broadcast %9 : vector<16x1xi32> to vector<16x32xi32>
    %11 = arith.cmpi eq, %7, %10 : vector<16x32xi32>
    %12 = arith.extui %11 : vector<16x32xi1> to vector<16x32xi32>
    %13 = arith.sitofp %12 : vector<16x32xi32> to vector<16x32xf32>
    %14 = arith.addf %8, %13 : vector<16x32xf32>
    %15 = vector.extract_strided_slice %6 {offsets = [0, 1], sizes = [16, 1], strides = [1, 1]} : vector<16x8xi32> to vector<16x1xi32>
    %16 = vector.broadcast %15 : vector<16x1xi32> to vector<16x32xi32>
    %17 = arith.cmpi eq, %7, %16 : vector<16x32xi32>
    %18 = arith.extui %17 : vector<16x32xi1> to vector<16x32xi32>
    %19 = arith.sitofp %18 : vector<16x32xi32> to vector<16x32xf32>
    %20 = arith.addf %14, %19 : vector<16x32xf32>
    %21 = vector.extract_strided_slice %6 {offsets = [0, 2], sizes = [16, 1], strides = [1, 1]} : vector<16x8xi32> to vector<16x1xi32>
    %22 = vector.broadcast %21 : vector<16x1xi32> to vector<16x32xi32>
    %23 = arith.cmpi eq, %7, %22 : vector<16x32xi32>
    %24 = arith.extui %23 : vector<16x32xi1> to vector<16x32xi32>
    %25 = arith.sitofp %24 : vector<16x32xi32> to vector<16x32xf32>
    %26 = arith.addf %20, %25 : vector<16x32xf32>
    %27 = vector.extract_strided_slice %6 {offsets = [0, 3], sizes = [16, 1], strides = [1, 1]} : vector<16x8xi32> to vector<16x1xi32>
    %28 = vector.broadcast %27 : vector<16x1xi32> to vector<16x32xi32>
    %29 = arith.cmpi eq, %7, %28 : vector<16x32xi32>
    %30 = arith.extui %29 : vector<16x32xi1> to vector<16x32xi32>
    %31 = arith.sitofp %30 : vector<16x32xi32> to vector<16x32xf32>
    %32 = arith.addf %26, %31 : vector<16x32xf32>
    %33 = vector.extract_strided_slice %6 {offsets = [0, 4], sizes = [16, 1], strides = [1, 1]} : vector<16x8xi32> to vector<16x1xi32>
    %34 = vector.broadcast %33 : vector<16x1xi32> to vector<16x32xi32>
    %35 = arith.cmpi eq, %7, %34 : vector<16x32xi32>
    %36 = arith.extui %35 : vector<16x32xi1> to vector<16x32xi32>
    %37 = arith.sitofp %36 : vector<16x32xi32> to vector<16x32xf32>
    %38 = arith.addf %32, %37 : vector<16x32xf32>
    %39 = vector.extract_strided_slice %6 {offsets = [0, 5], sizes = [16, 1], strides = [1, 1]} : vector<16x8xi32> to vector<16x1xi32>
    %40 = vector.broadcast %39 : vector<16x1xi32> to vector<16x32xi32>
    %41 = arith.cmpi eq, %7, %40 : vector<16x32xi32>
    %42 = arith.extui %41 : vector<16x32xi1> to vector<16x32xi32>
    %43 = arith.sitofp %42 : vector<16x32xi32> to vector<16x32xf32>
    %44 = arith.addf %38, %43 : vector<16x32xf32>
    %45 = vector.extract_strided_slice %6 {offsets = [0, 6], sizes = [16, 1], strides = [1, 1]} : vector<16x8xi32> to vector<16x1xi32>
    %46 = vector.broadcast %45 : vector<16x1xi32> to vector<16x32xi32>
    %47 = arith.cmpi eq, %7, %46 : vector<16x32xi32>
    %48 = arith.extui %47 : vector<16x32xi1> to vector<16x32xi32>
    %49 = arith.sitofp %48 : vector<16x32xi32> to vector<16x32xf32>
    %50 = arith.addf %44, %49 : vector<16x32xf32>
    %51 = vector.extract_strided_slice %6 {offsets = [0, 7], sizes = [16, 1], strides = [1, 1]} : vector<16x8xi32> to vector<16x1xi32>
    %52 = vector.broadcast %51 : vector<16x1xi32> to vector<16x32xi32>
    %53 = arith.cmpi eq, %7, %52 : vector<16x32xi32>
    %54 = arith.extui %53 : vector<16x32xi1> to vector<16x32xi32>
    %55 = arith.sitofp %54 : vector<16x32xi32> to vector<16x32xf32>
    %56 = arith.addf %50, %55 : vector<16x32xf32>
    %cst_9 = arith.constant dense<0.000000e+00> : vector<16x128xf32>
    %57 = tpu.matmul %56, %5, %cst_9 {dimension_numbers = #tpu.dot_dimension_numbers<[1], [0], [0], [1], [0, 0, 1, 1], [], []>} : vector<16x32xf32>, vector<32x128xf32>, vector<16x128xf32> -> vector<16x128xf32>
    %cst_10 = arith.constant 1.562500e-02 : f32
    %58 = vector.broadcast %cst_10 : f32 to vector<16x128xf32>
    %59 = arith.mulf %57, %58 : vector<16x128xf32>
    %c0_11 = arith.constant 0 : index
    %c0_12 = arith.constant 0 : index
    %60 = vector.load %arg5[%c0_11, %c0_12] : memref<1x128xf32, #tpu.memory_space<vmem>>, vector<1x128xf32>
    %61 = vector.broadcast %60 : vector<1x128xf32> to vector<16x128xf32>
    %62 = arith.mulf %59, %61 : vector<16x128xf32>
    %c0_13 = arith.constant 0 : index
    %c0_14 = arith.constant 0 : index
    %63 = vector.load %arg6[%c0_13, %c0_14] : memref<1x128xf32, #tpu.memory_space<vmem>>, vector<1x128xf32>
    %64 = vector.broadcast %63 : vector<1x128xf32> to vector<16x128xf32>
    %65 = arith.addf %62, %64 : vector<16x128xf32>
    %cst_15 = arith.constant 0.000000e+00 : f32
    %66 = vector.broadcast %cst_15 : f32 to vector<16x128xf32>
    %67 = arith.maximumf %65, %66 : vector<16x128xf32>
    %c0_16 = arith.constant 0 : index
    %c0_17 = arith.constant 0 : index
    %68 = vector.load %arg7[%c0_16, %c0_17] : memref<16x128xf32, #tpu.memory_space<vmem>>, vector<16x128xf32>
    tpu.vector_store %arg7[%c0_16, %c0_17], %67 {strides = array<i32>} : memref<16x128xf32, #tpu.memory_space<vmem>>, vector<16x128xf32>,
    return
  }
  func.func @transform_0(%arg0: i32) -> (i32, i32) {
    %c0_i32 = arith.constant 0 : i32
    %c0_i32_0 = arith.constant 0 : i32
    return %arg0, %c0_i32 : i32, i32
  }
  func.func @transform_1(%arg0: i32) -> (i32, i32) {
    %c0_i32 = arith.constant 0 : i32
    %c0_i32_0 = arith.constant 0 : i32
    %c0_i32_1 = arith.constant 0 : i32
    return %c0_i32, %c0_i32_0 : i32, i32
  }
  func.func @transform_2(%arg0: i32) -> (i32, i32) {
    %c0_i32 = arith.constant 0 : i32
    %c0_i32_0 = arith.constant 0 : i32
    %c0_i32_1 = arith.constant 0 : i32
    return %c0_i32, %c0_i32_0 : i32, i32
  }
  func.func @transform_3(%arg0: i32) -> (i32, i32) {
    %c0_i32 = arith.constant 0 : i32
    %c0_i32_0 = arith.constant 0 : i32
    %c0_i32_1 = arith.constant 0 : i32
    return %c0_i32, %c0_i32_0 : i32, i32
  }
  func.func @transform_4(%arg0: i32) -> (i32, i32) {
    %c0_i32 = arith.constant 0 : i32
    %c0_i32_0 = arith.constant 0 : i32
    %c0_i32_1 = arith.constant 0 : i32
    return %c0_i32, %c0_i32_0 : i32, i32
  }
  func.func @transform_5(%arg0: i32) -> (i32, i32) {
    %c0_i32 = arith.constant 0 : i32
    %c0_i32_0 = arith.constant 0 : i32
    %c0_i32_1 = arith.constant 0 : i32
    return %c0_i32, %c0_i32_0 : i32, i32
  }
  func.func @transform_6(%arg0: i32) -> (i32, i32) {
    %c0_i32 = arith.constant 0 : i32
    %c0_i32_0 = arith.constant 0 : i32
    return %arg0, %c0_i32 : i32, i32
  }
}

</mosaic_0001>

<bundles_post_ra>
// kernel: rw_prompt_forward.3
= control target key start
LH: loop header
LB: loop body
LE: loop exit
PB: predicated region body
PF: predicated region fallthrough
CT: control target
= control target key end

     0   :  { %s722_s21 = smov 0   ;;  %s908_s0 = inlined_call_operand.vmem [shape: s32[32,8], index: 0, kind: input, shape index: {}]   ;;  %s909_s1 = inlined_call_operand.vmem [shape: f32[32,128], index: 1, kind: input, shape index: {}]   ;;  %s910_s2 = inlined_call_operand.vmem [shape: f32[128,128], index: 2, kind: input, shape index: {}]   ;;  %s911_s3 = inlined_call_operand.vmem [shape: f32[128,128], index: 3, kind: input, shape index: {}]   ;;  %s912_s4 = inlined_call_operand.vmem [shape: f32[1,128], index: 4, kind: input, shape index: {}]   ;;  %s913_s5 = inlined_call_operand.vmem [shape: f32[1,128], index: 5, kind: input, shape index: {}]   ;;  %s914_s6 = inlined_call_operand.vmem [shape: f32[32,128], index: 6, kind: output, shape index: {}]  }
   0x1 LB: > { %s573_s22 = sadd.s32 4294967295, %s676_s21   ;;  %p577_p0 = scmp.ge.s32.totalorder %s676_s21, 1  ;;  %s676_s21 = sphi %s722_s21, %s16_s21  }
   0x2   : > { %p213_p1 = scmp.lt.s32.totalorder %s676_s21, 3 }
   0x4   : > { %p214_p2 = pnand %p577_p0, %p213_p1 }
   0x5   : > { %s578_s27 = sshll.u32 (!%p214_p2), %s573_s22, 1 }
   0x6   : > { %217 = sbr.rel (%p214_p2) target bundleno = 473 (0x1d9), region = 44  ;;  %p244_p3 = scmp.lt.s32.totalorder (!%p214_p2), %s578_s27, 3 }
   0xb   : > { %v274_v0 = vld [vmem:[%s910_s2 + $0x78] sm:$0xff]  ;;  %v273_v1 = vld [vmem:[%s910_s2 + $0x70] sm:$0xff]  ;;  %v272_v2 = vld [vmem:[%s910_s2 + $0x68] sm:$0xff]  ;;  %s916_s27 = smov (!%p244_p3, %s578_s27), 3  ;;  %v678_v10 = vmov 2   ;;  %v679_v15 = vmov 0   ;;  %v355_v59 = vlaneseq }
   0xc   : > { %275 = vmatpush.msra.mxu0 %v274_v0  ;;  %602 = vmatpush.msra.mxu3 %v274_v0  ;;  %v271_v3 = vld [vmem:[%s910_s2 + $0x60] sm:$0xff]  ;;  %s579_s8 = sshll.u32 %s916_s27, 3  ;;  %v270_v4 = vld [vmem:[%s910_s2 + $0x58] sm:$0xff]  ;;  %v269_v5 = vld [vmem:[%s910_s2 + $0x50] sm:$0xff]  ;;  %v680_v22 = vmov 3   ;;  %v681_v33 = vmov 1  }
   0xd   : > { %s753_s13 = scalar_lea.vmem %s908_s0, %s579_s8  ;;  %v323_v6 = vld [vmem:[%s911_s3 + $0x78] sm:$0xff]  ;;  %v322_v8 = vld [vmem:[%s911_s3 + $0x70] sm:$0xff]  ;;  %v268_v9 = vld [vmem:[%s910_s2 + $0x48] sm:$0xff]  ;;  %653 = vset.pattern.permute.xlu1 %v678_v10  ;;  %651 = vset.pattern.permute.xlu0 %v679_v15  ;;  %v682_v38 = vmov 4   ;;  %v683_v41 = vmov 6   ;;  %v684_v44 = vmov 7   ;;  %s253_s22 = scalar_lea.vmem %s914_s6, %s579_s8 }
   0xe   : > { %276 = vmatpush.msra.mxu0 %v273_v1  ;;  %603 = vmatpush.msra.mxu3 %v273_v1  ;;  %v762_v7 = vld [vmem:[%s753_s13] sm:$0xff]  ;;  %v321_v11 = vld [vmem:[%s911_s3 + $0x68] sm:$0xff]  ;;  %v266_v14 = vld [vmem:[%s910_s2 + $0x38] sm:$0xff]  ;;  %v685_v45 = vmov 5   ;;  %v876_v60 = vand.u32 127, %v355_v59  ;;  %v686_v0 = vmov 0.0  }
   0xf   : > { %324 = vmatpush.msra.mxu1 %v323_v6  ;;  %v267_v12 = vld [vmem:[%s910_s2 + $0x40] sm:$0xff]  ;;  %386 = vperm.xlu1 %653, %v762_v7   ;;  %v319_v16 = vld [vmem:[%s911_s3 + $0x58] sm:$0xff]  ;;  %v265_v17 = vld [vmem:[%s910_s2 + $0x30] sm:$0xff]  ;;  %vm469_vm15 = vcmask 261120  }
  0x10   : > { %277 = vmatpush.msra.mxu0 %v272_v2  ;;  %604 = vmatpush.msra.mxu3 %v272_v2  ;;  %v320_v13 = vld [vmem:[%s911_s3 + $0x60] sm:$0xff]  ;;  %v318_v18 = vld [vmem:[%s911_s3 + $0x50] sm:$0xff]  ;;  %v264_v19 = vld [vmem:[%s910_s2 + $0x28] sm:$0xff] }
  0x11   : > { %325 = vmatpush.msra.mxu1 %v322_v8  ;;  %618 = vmatpush.msra.mxu2 %v323_v6  ;;  %v317_v20 = vld [vmem:[%s911_s3 + $0x48] sm:$0xff]  ;;  %v263_v21 = vld [vmem:[%s910_s2 + $0x20] sm:$0xff]  ;;  %v262_v24 = vld [vmem:[%s910_s2 + $0x18] sm:$0xff] }
  0x12   : > { %278 = vmatpush.msra.mxu0 %v271_v3  ;;  %605 = vmatpush.msra.mxu3 %v271_v3  ;;  %v316_v23 = vld [vmem:[%s911_s3 + $0x40] sm:$0xff]  ;;  %v315_v25 = vld [vmem:[%s911_s3 + $0x38] sm:$0xff]  ;;  %v261_v26 = vld [vmem:[%s910_s2 + $0x10] sm:$0xff] }
  0x13   : > { %326 = vmatpush.msra.mxu1 %v321_v11  ;;  %358 = vperm.xlu0 %651, %v762_v7   ;;  %v314_v27 = vld [vmem:[%s911_s3 + $0x30] sm:$0xff]  ;;  %v260_v28 = vld [vmem:[%s910_s2 + $0x8] sm:$0xff]  ;;  %v259_v30 = vld [vmem:[%s910_s2] sm:$0xff] }
  0x14   : > { %279 = vmatpush.msra.mxu0 %v270_v4  ;;  %606 = vmatpush.msra.mxu3 %v270_v4  ;;  %v313_v29 = vld [vmem:[%s911_s3 + $0x28] sm:$0xff]  ;;  %v255_v31 = vld [vmem:[%s909_s1] sm:$0xff]  ;;  %v257_v32 = vld [vmem:[%s909_s1 + $0x10] sm:$0xff] }
  0x15   : > { %327 = vmatpush.msra.mxu1 %v320_v13  ;;  %619 = vmatpush.msra.mxu2 %v322_v8  ;;  %v837_v34 = vld [vmem:[%s753_s13 + $0x8] sm:$0xff]  ;;  %v312_v35 = vld [vmem:[%s911_s3 + $0x20] sm:$0xff]  ;;  %v311_v36 = vld [vmem:[%s911_s3 + $0x18] sm:$0xff] }
  0x16   : > { %280 = vmatpush.msra.mxu0 %v269_v5  ;;  %607 = vmatpush.msra.mxu3 %v269_v5  ;;  %v310_v37 = vld [vmem:[%s911_s3 + $0x10] sm:$0xff]  ;;  %v256_v39 = vld [vmem:[%s909_s1 + $0x8] sm:$0xff]  ;;  %v258_v40 = vld [vmem:[%s909_s1 + $0x18] sm:$0xff] }
  0x17   : > { %328 = vmatpush.msra.mxu1 %v319_v16  ;;  %654 = vset.pattern.permute.xlu1 %v680_v22  ;;  %v309_v42 = vld [vmem:[%s911_s3 + $0x8] sm:$0xff]  ;;  %v308_v43 = vld [vmem:[%s911_s3] sm:$0xff] }
  0x18   : > { %281 = vmatpush.msra.mxu0 %v268_v9  ;;  %608 = vmatpush.msra.mxu3 %v268_v9 }
  0x19   : > { %329 = vmatpush.msra.mxu1 %v318_v18  ;;  %400 = vperm.xlu1 %654, %v762_v7  }
  0x1a   : > { %282 = vmatpush.msra.mxu0 %v267_v12  ;;  %609 = vmatpush.msra.mxu3 %v267_v12 }
  0x1b   : > { %330 = vmatpush.msra.mxu1 %v317_v20  ;;  %620 = vmatpush.msra.mxu2 %v321_v11 }
  0x1c   : > { %283 = vmatpush.msra.mxu0 %v266_v14  ;;  %610 = vmatpush.msra.mxu3 %v266_v14 }
  0x1d   : > { %331 = vmatpush.msra.mxu1 %v316_v23  ;;  %621 = vmatpush.msra.mxu2 %v320_v13 }
  0x1e   : > { %284 = vmatpush.msra.mxu0 %v265_v17  ;;  %611 = vmatpush.msra.mxu3 %v265_v17 }
  0x1f   : > { %332 = vmatpush.msra.mxu1 %v315_v25  ;;  %622 = vmatpush.msra.mxu2 %v319_v16 }
  0x20   : > { %285 = vmatpush.msra.mxu0 %v264_v19  ;;  %612 = vmatpush.msra.mxu3 %v264_v19 }
  0x21   : > { %333 = vmatpush.msra.mxu1 %v314_v27  ;;  %657 = vset.pattern.permute.xlu1 %v681_v33 }
  0x22   : > { %286 = vmatpush.msra.mxu0 %v263_v21  ;;  %613 = vmatpush.msra.mxu3 %v263_v21 }
  0x23   : > { %334 = vmatpush.msra.mxu1 %v313_v29  ;;  %375 = vperm.xlu1 %657, %v837_v34  }
  0x24   : > { %287 = vmatpush.msra.mxu0 %v262_v24  ;;  %614 = vmatpush.msra.mxu3 %v262_v24 }
  0x25   : > { %335 = vmatpush.msra.mxu1 %v312_v35  ;;  %652 = vset.pattern.permute.xlu0 %v681_v33 }
  0x26   : > { %288 = vmatpush.msra.mxu0 %v261_v26  ;;  %615 = vmatpush.msra.mxu3 %v261_v26 }
  0x27   : > { %372 = vperm.xlu0 %652, %v762_v7   ;;  %623 = vmatpush.msra.mxu2 %v318_v18 }
  0x28   : > { %289 = vmatpush.msra.mxu0 %v260_v28  ;;  %616 = vmatpush.msra.mxu3 %v260_v28 }
  0x29   : > { %336 = vmatpush.msra.mxu1 %v311_v36  ;;  %655 = vset.pattern.permute.xlu2 %v682_v38 }
  0x2a   : > { %290 = vmatpush.msra.mxu0 %v259_v30  ;;  %617 = vmatpush.msra.mxu3 %v259_v30 }
  0x2b   : > { %291 = vmatmul.f32.vlgmr.msra.gmra.mxu0 %v255_v31  ;;  %297 = vmatmul.f32.vlgmr.msra.gmra.mxu3 %v257_v32 }
  0x2c   : > { %624 = vmatpush.msra.mxu2 %v317_v20  ;;  %414 = vperm.xlu2 %655, %v762_v7  }
  0x2d   : > { %337 = vmatpush.msra.mxu1 %v310_v37  ;;  %660 = vset.pattern.permute.xlu1 %v683_v41 }
  0x2e   : > { %625 = vmatpush.msra.mxu2 %v316_v23  ;;  %442 = vperm.xlu1 %660, %v762_v7  }
  0x2f   : > { %659 = vset.pattern.permute.xlu0 %v678_v10  ;;  %338 = vmatpush.msra.mxu1 %v309_v42 }
  0x30   : > { %626 = vmatpush.msra.mxu2 %v315_v25  ;;  %389 = vperm.xlu0 %659, %v837_v34  }
  0x31   : > { %339 = vmatpush.msra.mxu1 %v308_v43 }
  0x32   : > { %627 = vmatpush.msra.mxu2 %v314_v27 }
  0x33   : > { %294 = vmatmul.f32.gmra.mxu0 %v256_v39  ;;  %300 = vmatmul.f32.gmra.mxu3 %v258_v40 }
  0x34   : > { %628 = vmatpush.msra.mxu2 %v313_v29  ;;  %656 = vset.pattern.permute.xlu2 %v679_v15 }
  0x35   : > { %361 = vperm.xlu2 %656, %v837_v34  }
  0x36   : > { %629 = vmatpush.msra.mxu2 %v312_v35  ;;  %662 = vset.pattern.permute.xlu1 %v684_v44 }
  0x37   : > { %456 = vperm.xlu1 %662, %v762_v7  }
  0x38   : > { %630 = vmatpush.msra.mxu2 %v311_v36  ;;  %664 = vset.pattern.permute.xlu0 %v685_v45 }
  0x39   : > { %431 = vperm.xlu0 %664, %v837_v34  }
  0x3a   : > { %631 = vmatpush.msra.mxu2 %v310_v37 }
  0x3c   : > { %632 = vmatpush.msra.mxu2 %v309_v42 }
  0x3d   : > { %658 = vset.pattern.permute.xlu2 %v685_v45 }
  0x3e   : > { %633 = vmatpush.msra.mxu2 %v308_v43  ;;  %428 = vperm.xlu2 %658, %v762_v7   ;;  %v668_v43 = vld [vmem:[%s912_s4] ss:$0 sm:$0xff] }
  0x3f   : > { %665 = vset.pattern.permute.xlu1 %v683_v41 }
  0x40   : > { %445 = vperm.xlu1 %665, %v837_v34  }
  0x41   : > { %667 = vset.pattern.permute.xlu0 %v684_v44 }
  0x46   : > { %661 = vset.pattern.permute.xlu2 %v680_v22 }
  0x47   : > { %403 = vperm.xlu2 %661, %v837_v34  }
  0x4f   : > { %663 = vset.pattern.permute.xlu2 %v682_v38 }
  0x50   : > { %417 = vperm.xlu2 %663, %v837_v34  }
  0x58   : > { %666 = vset.pattern.permute.xlu2 %v684_v44 }
  0x59   : > { %459 = vperm.xlu2 %666, %v837_v34  }
  0x81   : > { %v387_v54 = vpop.permute.xlu1 %386 }
  0x82   : > { %vm391_vm2 = vcmp.eq.s32.totalorder %v876_v60, %v387_v54 }
  0x83   : > { %v586_v5 = vsel %vm391_vm2, 1.0, %v686_v0 }
  0x85   : > { %v359_v57 = vpop.permute.xlu0 %358 }
  0x86   : > { %v415_v55 = vpop.permute.xlu2 %414  ;;  %vm363_vm0 = vcmp.eq.s32.totalorder %v876_v60, %v359_v57 }
  0x87   : > { %v582_v1 = vsel %vm363_vm0, 1.0, %v686_v0  ;;  %vm419_vm6 = vcmp.eq.s32.totalorder %v876_v60, %v415_v55 }
  0x88   : > { %v590_v15 = vsel %vm419_vm6, 1.0, %v686_v0 }
  0x8b   : > { %v401_v56 = vpop.permute.xlu1 %400 }
  0x8c   : > { %vm405_vm3 = vcmp.eq.s32.totalorder %v876_v60, %v401_v56 }
  0x8d   : > { %v588_v9 = vsel %vm405_vm3, 1.0, %v686_v0 }
  0x8f   : > { %v362_v58 = vpop.permute.xlu2 %361 }
  0x90   : > { %vm364_vm4 = vcmp.eq.s32.totalorder %v876_v60, %v362_v58 }
  0x91   : > { %v583_v10 = vsel %vm364_vm4, 1.0, %v686_v0 }
  0x95   : > { %v376_v61 = vpop.permute.xlu1 %375 }
  0x96   : > { %vm378_vm5 = vcmp.eq.s32.totalorder %v876_v60, %v376_v61 }
  0x97   : > { %v585_v11 = vsel %vm378_vm5, 1.0, %v686_v0 }
  0x98   : > { %v429_v63 = vpop.permute.xlu2 %428  ;;  %v384_v13 = vadd.f32 %v585_v11, %v583_v10 }
  0x99   : > { %v373_v62 = vpop.permute.xlu0 %372  ;;  %vm433_vm8 = vcmp.eq.s32.totalorder %v876_v60, %v429_v63 }
  0x9a   : > { %vm377_vm1 = vcmp.eq.s32.totalorder %v876_v60, %v373_v62  ;;  %v592_v21 = vsel %vm433_vm8, 1.0, %v686_v0 }
  0x9b   : > { %v584_v2 = vsel %vm377_vm1, 1.0, %v686_v0 }
  0x9c   : > { %v383_v3 = vadd.f32 %v584_v2, %v582_v1 }
  0x9e   : > { %v397_v8 = vadd.f32 %v586_v5, %v383_v3 }
  0xa0   : > { %v443_v6 = vpop.permute.xlu1 %442  ;;  %v411_v14 = vadd.f32 %v588_v9, %v397_v8 }
  0xa1   : > { %v404_v7 = vpop.permute.xlu2 %403  ;;  %vm447_vm10 = vcmp.eq.s32.totalorder %v876_v60, %v443_v6 }
  0xa2   : > { %v390_v12 = vpop.permute.xlu0 %389  ;;  %vm406_vm9 = vcmp.eq.s32.totalorder %v876_v60, %v404_v7  ;;  %v425_v19 = vadd.f32 %v590_v15, %v411_v14  ;;  %v594_v27 = vsel %vm447_vm10, 1.0, %v686_v0 }
  0xa3   : > { %vm392_vm7 = vcmp.eq.s32.totalorder %v876_v60, %v390_v12  ;;  %v589_v22 = vsel %vm406_vm9, 1.0, %v686_v0 }
  0xa4   : > { %v587_v16 = vsel %vm392_vm7, 1.0, %v686_v0  ;;  %v439_v25 = vadd.f32 %v592_v21, %v425_v19 }
  0xa5   : > { %v398_v20 = vadd.f32 %v587_v16, %v384_v13 }
  0xa6   : > { %v453_v31 = vadd.f32 %v594_v27, %v439_v25 }
  0xa7   : > { %v412_v26 = vadd.f32 %v589_v22, %v398_v20 }
  0xa8   : > { %v292_v46 = vpop.f32.mrf.mxu0 }
  0xa9   : > { %v304_v47 = vmul.f32 %v292_v46, %v292_v46  ;;  %v457_v18 = vpop.permute.xlu1 %456  ;;  %v669_v46 = vld [vmem:[%s913_s5] ss:$0 sm:$0xff] }
  0xaa   : > { %v418_v23 = vpop.permute.xlu2 %417  ;;  %vm461_vm12 = vcmp.eq.s32.totalorder %v876_v60, %v457_v18 }
  0xab   : > { %340 = vmatmul.f32.vlgmr.msra.gmra.mxu1 %v304_v47  ;;  %vm420_vm11 = vcmp.eq.s32.totalorder %v876_v60, %v418_v23  ;;  %v432_v24 = vpop.permute.xlu0 %431  ;;  %v596_v34 = vsel %vm461_vm12, 1.0, %v686_v0 }
  0xac   : > { %v591_v28 = vsel %vm420_vm11, 1.0, %v686_v0  ;;  %vm434_vm13 = vcmp.eq.s32.totalorder %v876_v60, %v432_v24  ;;  %v467_v37 = vadd.f32 %v596_v34, %v453_v31 }
  0xad   : > { %v426_v32 = vadd.f32 %v591_v28, %v412_v26  ;;  %v593_v35 = vsel %vm434_vm13, 1.0, %v686_v0 }
  0xae   : > { %v298_v48 = vpop.f32.mrf.mxu3 }
  0xaf   : > { %v306_v53 = vmul.f32 %v298_v48, %v298_v48  ;;  %v440_v38 = vadd.f32 %v593_v35, %v426_v32 }
  0xb0   : > { %v295_v49 = vpop.f32.mrf.mxu0 }
  0xb1   : > { %v305_v50 = vmul.f32 %v295_v49, %v295_v49 }
  0xb2   : > { %v446_v30 = vpop.permute.xlu1 %445 }
  0xb3   : > { %343 = vmatmul.f32.gmra.mxu1 %v305_v50  ;;  %vm448_vm14 = vcmp.eq.s32.totalorder %v876_v60, %v446_v30  ;;  %v460_v36 = vpop.permute.xlu2 %459 }
  0xb4   : > { %v595_v39 = vsel %vm448_vm14, 1.0, %v686_v0  ;;  %vm462_vm0 = vcmp.eq.s32.totalorder %v876_v60, %v460_v36 }
  0xb5   : > { %v454_v40 = vadd.f32 %v595_v39, %v440_v38  ;;  %v597_v41 = vsel %vm462_vm0, 1.0, %v686_v0 }
  0xb6   : > { %v301_v51 = vpop.f32.mrf.mxu3 }
  0xb7   : > { %v307_v52 = vmul.f32 %v301_v51, %v301_v51  ;;  %v468_v42 = vadd.f32 %v597_v41, %v454_v40 }
  0xb9   : > { %349 = vmatmul.f32.vlgmr.msra.gmra.mxu2 %v307_v52 }
  0xbb   : > { %346 = vmatmul.f32.gmra.mxu1 %v306_v53 }
 0x128   : > { %v341_v4 = vpop.f32.mrf.mxu1 }
 0x130   : > { %v344_v17 = vpop.f32.mrf.mxu1 }
 0x138   : > { %v347_v33 = vpop.f32.mrf.mxu1 }
 0x13c   : > { %v350_v29 = vpop.f32.mrf.mxu2 }
 0x13d   : > { %488 = vmatpush.msrb.mxu2 %v350_v29 }
 0x13f   : > { %489 = vmatpush.msrb.mxu2 %v347_v33 }
 0x141   : > { %490 = vmatpush.msrb.mxu2 %v344_v17 }
 0x143   : > { %491 = vmatpush.msrb.mxu2 %v341_v4 }
 0x144   : > { %598 = vmatmul.msk.f32.vlgmr.msrb.gmra.mxu2 %vm469_vm15, %v467_v37 }
 0x14c   : > { %599 = vmatmul.msk.f32.gmra.mxu2 %vm469_vm15, %v468_v42 }
 0x1c7   : > { %v493_v44 = vpop.f32.mrf.mxu2 }
 0x1c8   : > { %v499_v45 = vmul.f32 0.015625, %v493_v44 }
 0x1ca   : > { %v505_v47 = vmul.f32 %v668_v43, %v499_v45 }
 0x1cc   : > { %v511_v48 = vadd.f32 %v669_v46, %v505_v47 }
 0x1ce   : > { %v513_v49 = vmax.f32 %v511_v48, 0.0 }
 0x1cf   : > { %v496_v50 = vpop.f32.mrf.mxu2 }
 0x1d0   : > { %515 = vst [vmem:[%s253_s22] sm:$0xff] %v513_v49  ;;  %v500_v51 = vmul.f32 0.015625, %v496_v50 }
 0x1d2   : > { %v506_v52 = vmul.f32 %v668_v43, %v500_v51 }
 0x1d4   : > { %v512_v53 = vadd.f32 %v669_v46, %v506_v52 }
 0x1d6   : > { %v514_v54 = vmax.f32 %v512_v53, 0.0 }
 0x1d8   : > { %516 = vst [vmem:[%s253_s22 + $0x8] sm:$0xff] %v514_v54 }
 0x1d9 PF: > { %s16_s21 = sadd.s32 1, %s676_s21  }
 0x1da   : > { %p13_p4 = scmp.ge.s32.totalorder %s16_s21, 4  }
 0x1dc   :  { %15 = sbr.rel (!%p13_p4) target bundleno = 1 (0x1), region = 74 }

// kernel: rw_prompt_forward.2
= control target key start
LH: loop header
LB: loop body
LE: loop exit
PB: predicated region body
PF: predicated region fallthrough
CT: control target
= control target key end

     0   :  { %s895_s27 = smov 0   ;;  %s1146_s0 = inlined_call_operand.vmem [shape: s32[32,8], index: 0, kind: input, shape index: {}]   ;;  %s1147_s1 = inlined_call_operand.vmem [shape: f32[32,128], index: 1, kind: input, shape index: {}]   ;;  %s1148_s2 = inlined_call_operand.vmem [shape: f32[128,16], index: 2, kind: input, shape index: {}]   ;;  %s1149_s3 = inlined_call_operand.vmem [shape: f32[1,16], index: 3, kind: input, shape index: {}]   ;;  %s1150_s4 = inlined_call_operand.vmem [shape: f32[16,256], index: 4, kind: input, shape index: {}]   ;;  %s1151_s5 = inlined_call_operand.vmem [shape: f32[256,128], index: 5, kind: input, shape index: {}]   ;;  %s1152_s6 = inlined_call_operand.vmem [shape: f32[1,128], index: 6, kind: input, shape index: {}]   ;;  %s1153_s7 = inlined_call_operand.vmem [shape: f32[1,128], index: 7, kind: input, shape index: {}]   ;;  %s1154_s8 = inlined_call_operand.vmem [shape: f32[32,128], index: 8, kind: output, shape index: {}]  }
   0x1 LB: > { %s759_s28 = sadd.s32 4294967295, %s839_s27   ;;  %p763_p0 = scmp.ge.s32.totalorder %s839_s27, 1  ;;  %s839_s27 = sphi %s895_s27, %s18_s27  }
   0x2   : > { %p263_p1 = scmp.lt.s32.totalorder %s839_s27, 3 }
   0x4   : > { %p264_p2 = pnand %p763_p0, %p263_p1 }
   0x5   : > { %s764_s29 = sshll.u32 (!%p264_p2), %s759_s28, 1 }
   0x6   : > { %267 = sbr.rel (%p264_p2) target bundleno = 615 (0x267), region = 52  ;;  %p298_p3 = scmp.lt.s32.totalorder (!%p264_p2), %s764_s29, 3 }
   0xb   : > { %v328_v0 = vld [vmem:[%s1148_s2 + $0x78] sm:$0xff]  ;;  %v327_v1 = vld [vmem:[%s1148_s2 + $0x70] sm:$0xff]  ;;  %v326_v2 = vld [vmem:[%s1148_s2 + $0x68] sm:$0xff]  ;;  %vm370_vm0 = vcmask 130048   ;;  %s1156_s29 = smov (!%p298_p3, %s764_s29), 3  ;;  %v841_v62 = vmov 2  }
   0xc   : > { %333 = vmatpush.msra.mxu0 %v328_v0  ;;  %v325_v3 = vld [vmem:[%s1148_s2 + $0x60] sm:$0xff]  ;;  %v324_v4 = vld [vmem:[%s1148_s2 + $0x58] sm:$0xff]  ;;  %v323_v5 = vld [vmem:[%s1148_s2 + $0x50] sm:$0xff]  ;;  %s765_s30 = sshll.u32 %s1156_s29, 3  ;;  %815 = vset.pattern.permute.xlu1 %v841_v62  ;;  %v842_v0 = vmov 3  }
   0xd   : > { %v322_v6 = vld [vmem:[%s1148_s2 + $0x48] sm:$0xff]  ;;  %v321_v7 = vld [vmem:[%s1148_s2 + $0x40] sm:$0xff]  ;;  %v320_v8 = vld [vmem:[%s1148_s2 + $0x38] sm:$0xff]  ;;  %s301_s11 = scalar_lea.vmem %s1146_s0, %s765_s30  ;;  %s307_s12 = scalar_lea.vmem %s1154_s8, %s765_s30 }
   0xe   : > { %334 = vmatpush.msra.mxu0 %v327_v1  ;;  %v319_v9 = vld [vmem:[%s1148_s2 + $0x30] sm:$0xff]  ;;  %v318_v10 = vld [vmem:[%s1148_s2 + $0x28] sm:$0xff]  ;;  %v317_v11 = vld [vmem:[%s1148_s2 + $0x20] sm:$0xff]  ;;  %v843_v1 = vmov 0  }
   0xf   : > { %v316_v12 = vld [vmem:[%s1148_s2 + $0x18] sm:$0xff]  ;;  %v315_v13 = vld [vmem:[%s1148_s2 + $0x10] sm:$0xff]  ;;  %v314_v14 = vld [vmem:[%s1148_s2 + $0x8] sm:$0xff]  ;;  %813 = vset.pattern.permute.xlu0 %v843_v1 }
  0x10   : > { %335 = vmatpush.msra.mxu0 %v326_v2  ;;  %v313_v15 = vld [vmem:[%s1148_s2] sm:$0xff]  ;;  %v310_v17 = vld [vmem:[%s1147_s1 + $0x8] sm:$0xff]  ;;  %v311_v18 = vld [vmem:[%s1147_s1 + $0x10] sm:$0xff] }
  0x11   : > { %v309_v16 = vld [vmem:[%s1147_s1] sm:$0xff]  ;;  %v312_v19 = vld [vmem:[%s1147_s1 + $0x18] sm:$0xff]  ;;  %v368_v20 = vld [vmem:[%s1150_s4 + $0x10] sm:$0xff] }
  0x12   : > { %336 = vmatpush.msra.mxu0 %v325_v3  ;;  %v369_v21 = vld [vmem:[%s1150_s4 + $0x18] sm:$0xff]  ;;  %397 = vmatpush.msra.mxu1 %v368_v20  ;;  %v366_v22 = vld [vmem:[%s1150_s4] sm:$0xff]  ;;  %v367_v23 = vld [vmem:[%s1150_s4 + $0x8] sm:$0xff] }
  0x13   : > { %426 = vmatpush.msra.mxu2 %v369_v21  ;;  %v978_v24 = vld [vmem:[%s1149_s3] ss:$0 sm:$0xff]  ;;  %v464_v25 = vld [vmem:[%s1151_s5 + $0x78] sm:$0xff]  ;;  %v463_v26 = vld [vmem:[%s1151_s5 + $0x70] sm:$0xff] }
  0x14   : > { %337 = vmatpush.msra.mxu0 %v324_v4  ;;  %398 = vmatpush.msra.mxu1 %v366_v22  ;;  %v480_v27 = vld [vmem:[%s1151_s5 + $0xf8] sm:$0xff]  ;;  %v462_v28 = vld [vmem:[%s1151_s5 + $0x68] sm:$0xff]  ;;  %v479_v29 = vld [vmem:[%s1151_s5 + $0xf0] sm:$0xff]  ;;  %v844_v4 = vmov 1  }
  0x15   : > { %427 = vmatpush.msra.mxu2 %v367_v23  ;;  %481 = vmatpush.msra.mxu3 %v464_v25  ;;  %v478_v31 = vld [vmem:[%s1151_s5 + $0xe8] sm:$0xff]  ;;  %v461_v33 = vld [vmem:[%s1151_s5 + $0x60] sm:$0xff]  ;;  %v460_v35 = vld [vmem:[%s1151_s5 + $0x58] sm:$0xff] }
  0x16   : > { %338 = vmatpush.msra.mxu0 %v323_v5  ;;  %510 = vmatpush.msrb.mxu1 %v480_v27  ;;  %v477_v36 = vld [vmem:[%s1151_s5 + $0xe0] sm:$0xff]  ;;  %v459_v37 = vld [vmem:[%s1151_s5 + $0x50] sm:$0xff]  ;;  %v476_v38 = vld [vmem:[%s1151_s5 + $0xd8] sm:$0xff] }
  0x17   : > { %482 = vmatpush.msra.mxu3 %v463_v26  ;;  %v458_v39 = vld [vmem:[%s1151_s5 + $0x48] sm:$0xff]  ;;  %v475_v40 = vld [vmem:[%s1151_s5 + $0xd0] sm:$0xff]  ;;  %v457_v43 = vld [vmem:[%s1151_s5 + $0x40] sm:$0xff] }
  0x18   : > { %339 = vmatpush.msra.mxu0 %v322_v6  ;;  %511 = vmatpush.msrb.mxu1 %v479_v29  ;;  %v474_v44 = vld [vmem:[%s1151_s5 + $0xc8] sm:$0xff]  ;;  %v456_v46 = vld [vmem:[%s1151_s5 + $0x38] sm:$0xff]  ;;  %v473_v47 = vld [vmem:[%s1151_s5 + $0xc0] sm:$0xff] }
  0x19   : > { %483 = vmatpush.msra.mxu3 %v462_v28  ;;  %v455_v48 = vld [vmem:[%s1151_s5 + $0x30] sm:$0xff]  ;;  %v472_v49 = vld [vmem:[%s1151_s5 + $0xb8] sm:$0xff]  ;;  %v454_v50 = vld [vmem:[%s1151_s5 + $0x28] sm:$0xff] }
  0x1a   : > { %340 = vmatpush.msra.mxu0 %v321_v7  ;;  %512 = vmatpush.msrb.mxu1 %v478_v31  ;;  %v471_v51 = vld [vmem:[%s1151_s5 + $0xb0] sm:$0xff]  ;;  %v453_v54 = vld [vmem:[%s1151_s5 + $0x20] sm:$0xff]  ;;  %v470_v55 = vld [vmem:[%s1151_s5 + $0xa8] sm:$0xff] }
  0x1b   : > { %484 = vmatpush.msra.mxu3 %v461_v33  ;;  %v452_v57 = vld [vmem:[%s1151_s5 + $0x18] sm:$0xff]  ;;  %v451_v58 = vld [vmem:[%s1151_s5 + $0x10] sm:$0xff]  ;;  %v539_v63 = vld [vmem:[%s301_s11] sm:$0xff] }
  0x1c   : > { %341 = vmatpush.msra.mxu0 %v320_v8  ;;  %513 = vmatpush.msrb.mxu1 %v477_v36  ;;  %v450_v2 = vld [vmem:[%s1151_s5 + $0x8] sm:$0xff]  ;;  %v469_v3 = vld [vmem:[%s1151_s5 + $0xa0] sm:$0xff]  ;;  %v468_v7 = vld [vmem:[%s1151_s5 + $0x98] sm:$0xff]  ;;  %v541_v36 = vlaneseq }
  0x1d   : > { %485 = vmatpush.msra.mxu3 %v460_v35  ;;  %572 = vperm.xlu1 %815, %v539_v63   ;;  %v540_v5 = vld [vmem:[%s301_s11 + $0x8] sm:$0xff]  ;;  %v449_v6 = vld [vmem:[%s1151_s5] sm:$0xff]  ;;  %v467_v8 = vld [vmem:[%s1151_s5 + $0x90] sm:$0xff] }
  0x1e   : > { %342 = vmatpush.msra.mxu0 %v319_v9  ;;  %514 = vmatpush.msrb.mxu1 %v476_v38  ;;  %v466_v9 = vld [vmem:[%s1151_s5 + $0x88] sm:$0xff] }
  0x1f   : > { %486 = vmatpush.msra.mxu3 %v459_v37  ;;  %544 = vperm.xlu0 %813, %v539_v63   ;;  %v1098_v37 = vand.u32 127, %v541_v36 }
  0x20   : > { %343 = vmatpush.msra.mxu0 %v318_v10  ;;  %515 = vmatpush.msrb.mxu1 %v475_v40  ;;  %v465_v10 = vld [vmem:[%s1151_s5 + $0x80] sm:$0xff] }
  0x21   : > { %487 = vmatpush.msra.mxu3 %v458_v39 }
  0x22   : > { %344 = vmatpush.msra.mxu0 %v317_v11  ;;  %516 = vmatpush.msrb.mxu1 %v474_v44  ;;  %v845_v11 = vmov 6  }
  0x23   : > { %488 = vmatpush.msra.mxu3 %v457_v43  ;;  %v849_v43 = vmov 0.0  }
  0x24   : > { %345 = vmatpush.msra.mxu0 %v316_v12  ;;  %517 = vmatpush.msrb.mxu1 %v473_v47  ;;  %v846_v12 = vmov 4  }
  0x25   : > { %489 = vmatpush.msra.mxu3 %v456_v46  ;;  %816 = vset.pattern.permute.xlu1 %v842_v0 }
  0x26   : > { %346 = vmatpush.msra.mxu0 %v315_v13  ;;  %518 = vmatpush.msrb.mxu1 %v472_v49  ;;  %v847_v13 = vmov 7  }
  0x27   : > { %490 = vmatpush.msra.mxu3 %v455_v48  ;;  %586 = vperm.xlu1 %816, %v539_v63  }
  0x28   : > { %347 = vmatpush.msra.mxu0 %v314_v14  ;;  %519 = vmatpush.msrb.mxu1 %v471_v51  ;;  %v848_v14 = vmov 5  }
  0x29   : > { %491 = vmatpush.msra.mxu3 %v454_v50  ;;  %814 = vset.pattern.permute.xlu0 %v844_v4 }
  0x2a   : > { %348 = vmatpush.msra.mxu0 %v313_v15  ;;  %520 = vmatpush.msrb.mxu1 %v470_v55 }
  0x2b   : > { %349 = vmatmul.f32.vlgmr.msra.gmra.mxu0 %v309_v16  ;;  %492 = vmatpush.msra.mxu3 %v453_v54 }
  0x2c   : > { %521 = vmatpush.msrb.mxu1 %v469_v3  ;;  %558 = vperm.xlu0 %814, %v539_v63  }
  0x2d   : > { %493 = vmatpush.msra.mxu3 %v452_v57  ;;  %817 = vset.pattern.permute.xlu2 %v846_v12 }
  0x2e   : > { %522 = vmatpush.msrb.mxu1 %v468_v7  ;;  %600 = vperm.xlu2 %817, %v539_v63  }
  0x2f   : > { %494 = vmatpush.msra.mxu3 %v451_v58  ;;  %819 = vset.pattern.permute.xlu1 %v844_v4 }
  0x30   : > { %561 = vperm.xlu1 %819, %v540_v5   ;;  %523 = vmatpush.msrb.mxu1 %v467_v8 }
  0x31   : > { %495 = vmatpush.msra.mxu3 %v450_v2 }
  0x32   : > { %524 = vmatpush.msrb.mxu1 %v466_v9 }
  0x33   : > { %352 = vmatmul.f32.gmra.mxu0 %v310_v17  ;;  %496 = vmatpush.msra.mxu3 %v449_v6 }
  0x34   : > { %525 = vmatpush.msrb.mxu1 %v465_v10  ;;  %821 = vset.pattern.permute.xlu0 %v841_v62 }
  0x35   : > { %575 = vperm.xlu0 %821, %v540_v5  }
  0x36   : > { %818 = vset.pattern.permute.xlu2 %v843_v1 }
  0x37   : > { %547 = vperm.xlu2 %818, %v540_v5  }
  0x38   : > { %822 = vset.pattern.permute.xlu1 %v845_v11 }
  0x39   : > { %628 = vperm.xlu1 %822, %v539_v63  }
  0x3b   : > { %355 = vmatmul.f32.gmra.mxu0 %v311_v18 }
  0x3d   : > { %826 = vset.pattern.permute.xlu0 %v848_v14 }
  0x3e   : > { %617 = vperm.xlu0 %826, %v540_v5  }
  0x3f   : > { %820 = vset.pattern.permute.xlu2 %v848_v14 }
  0x40   : > { %614 = vperm.xlu2 %820, %v539_v63  }
  0x41   : > { %824 = vset.pattern.permute.xlu1 %v847_v13 }
  0x42   : > { %642 = vperm.xlu1 %824, %v539_v63  }
  0x43   : > { %358 = vmatmul.f32.gmra.mxu0 %v312_v19 }
  0x46   : > { %829 = vset.pattern.permute.xlu0 %v847_v13 }
  0x48   : > { %823 = vset.pattern.permute.xlu2 %v842_v0 }
  0x49   : > { %589 = vperm.xlu2 %823, %v540_v5  }
  0x4a   : > { %827 = vset.pattern.permute.xlu1 %v845_v11 }
  0x4b   : > { %631 = vperm.xlu1 %827, %v540_v5  }
  0x51   : > { %825 = vset.pattern.permute.xlu2 %v846_v12 }
  0x52   : > { %603 = vperm.xlu2 %825, %v540_v5  }
  0x5a   : > { %828 = vset.pattern.permute.xlu2 %v847_v13 }
  0x5b   : > { %645 = vperm.xlu2 %828, %v540_v5  }
  0x8f   : > { %v573_v31 = vpop.permute.xlu1 %572 }
  0x90   : > { %vm577_vm3 = vcmp.eq.s32.totalorder %v1098_v37, %v573_v31  ;;  %v832_v31 = vld [vmem:[%s1153_s7] ss:$0 sm:$0xff] }
  0x91   : > { %v780_v49 = vsel %vm577_vm3, 1.0, %v849_v43 }
  0x99   : > { %v587_v33 = vpop.permute.xlu1 %586 }
  0x9a   : > { %vm591_vm4 = vcmp.eq.s32.totalorder %v1098_v37, %v587_v33 }
  0xa2   : > { %v562_v38 = vpop.permute.xlu1 %561 }
  0xa3   : > { %vm564_vm6 = vcmp.eq.s32.totalorder %v1098_v37, %v562_v38 }
  0xa4   : > { %v779_v55 = vsel %vm564_vm6, 1.0, %v849_v43 }
  0xa8   : > { %v350_v30 = vpop.f32.mrf.mxu0 }
  0xa9   : > { %v351_v32 = vadd.f32 %v978_v24, %v350_v30 }
  0xab   : > { %v362_v34 = vmax.f32 %v351_v32, 0.0  ;;  %v601_v32 = vpop.permute.xlu2 %600  ;;  %v629_v50 = vpop.permute.xlu1 %628 }
  0xac   : > { %vm605_vm7 = vcmp.eq.s32.totalorder %v1098_v37, %v601_v32  ;;  %vm633_vm11 = vcmp.eq.s32.totalorder %v1098_v37, %v629_v50 }
  0xad   : > { %768 = vmatmul.msk.f32.vlgmr.msra.gmra.mxu1 %vm370_vm0, %v362_v34  ;;  %772 = vmatmul.msk.f32.vlgmr.msra.gmra.mxu2 %vm370_vm0, %v362_v34  ;;  %v545_v34 = vpop.permute.xlu0 %544  ;;  %v788_v10 = vsel %vm633_vm11, 1.0, %v849_v43 }
  0xae   : > { %vm549_vm1 = vcmp.eq.s32.totalorder %v1098_v37, %v545_v34 }
  0xaf   : > { %v776_v44 = vsel %vm549_vm1, 1.0, %v849_v43 }
  0xb0   : > { %v353_v41 = vpop.f32.mrf.mxu0 }
  0xb1   : > { %v354_v42 = vadd.f32 %v978_v24, %v353_v41 }
  0xb3   : > { %v363_v45 = vmax.f32 %v354_v42, 0.0  ;;  %v548_v35 = vpop.permute.xlu2 %547 }
  0xb4   : > { %vm550_vm5 = vcmp.eq.s32.totalorder %v1098_v37, %v548_v35  ;;  %v643_v63 = vpop.permute.xlu1 %642 }
  0xb5   : > { %769 = vmatmul.msk.f32.gmra.mxu1 %vm370_vm0, %v363_v45  ;;  %773 = vmatmul.msk.f32.gmra.mxu2 %vm370_vm0, %v363_v45  ;;  %v559_v39 = vpop.permute.xlu0 %558  ;;  %v777_v54 = vsel %vm550_vm5, 1.0, %v849_v43  ;;  %vm647_vm13 = vcmp.eq.s32.totalorder %v1098_v37, %v643_v63 }
  0xb6   : > { %vm563_vm2 = vcmp.eq.s32.totalorder %v1098_v37, %v559_v39  ;;  %v570_v57 = vadd.f32 %v779_v55, %v777_v54 }
  0xb7   : > { %v778_v45 = vsel %vm563_vm2, 1.0, %v849_v43 }
  0xb8   : > { %v356_v52 = vpop.f32.mrf.mxu0  ;;  %v569_v48 = vadd.f32 %v778_v45, %v776_v44 }
  0xb9   : > { %v357_v53 = vadd.f32 %v978_v24, %v356_v52 }
  0xba   : > { %v583_v52 = vadd.f32 %v780_v49, %v569_v48 }
  0xbb   : > { %v364_v56 = vmax.f32 %v357_v53, 0.0  ;;  %v615_v42 = vpop.permute.xlu2 %614  ;;  %v782_v53 = vsel %vm591_vm4, 1.0, %v849_v43 }
  0xbc   : > { %v597_v58 = vadd.f32 %v782_v53, %v583_v52  ;;  %vm619_vm9 = vcmp.eq.s32.totalorder %v1098_v37, %v615_v42 }
  0xbd   : > { %770 = vmatmul.msk.f32.gmra.mxu1 %vm370_vm0, %v364_v56  ;;  %774 = vmatmul.msk.f32.gmra.mxu2 %vm370_vm0, %v364_v56  ;;  %v576_v56 = vpop.permute.xlu0 %575  ;;  %v786_v2 = vsel %vm619_vm9, 1.0, %v849_v43  ;;  %v632_v14 = vpop.permute.xlu1 %631 }
  0xbe   : > { %vm578_vm8 = vcmp.eq.s32.totalorder %v1098_v37, %v576_v56  ;;  %vm634_vm15 = vcmp.eq.s32.totalorder %v1098_v37, %v632_v14 }
  0xbf   : > { %v781_v62 = vsel %vm578_vm8, 1.0, %v849_v43 }
  0xc0   : > { %v359_v59 = vpop.f32.mrf.mxu0  ;;  %v584_v1 = vadd.f32 %v781_v62, %v570_v57 }
  0xc1   : > { %v360_v60 = vadd.f32 %v978_v24, %v359_v59 }
  0xc3   : > { %v365_v61 = vmax.f32 %v360_v60, 0.0  ;;  %v590_v51 = vpop.permute.xlu2 %589 }
  0xc4   : > { %vm592_vm10 = vcmp.eq.s32.totalorder %v1098_v37, %v590_v51 }
  0xc5   : > { %771 = vmatmul.msk.f32.gmra.mxu1 %vm370_vm0, %v365_v61  ;;  %775 = vmatmul.msk.f32.gmra.mxu2 %vm370_vm0, %v365_v61  ;;  %v784_v61 = vsel %vm605_vm7, 1.0, %v849_v43  ;;  %v783_v3 = vsel %vm592_vm10, 1.0, %v849_v43  ;;  %v618_v5 = vpop.permute.xlu0 %617  ;;  %vm655_vm0 = vcmask 261120  }
  0xc6   : > { %v611_v0 = vadd.f32 %v784_v61, %v597_v58  ;;  %v598_v9 = vadd.f32 %v783_v3, %v584_v1  ;;  %vm620_vm14 = vcmp.eq.s32.totalorder %v1098_v37, %v618_v5 }
  0xc8   : > { %v625_v6 = vadd.f32 %v786_v2, %v611_v0 }
  0xcb   : > { %v604_v4 = vpop.permute.xlu2 %603 }
  0xcc   : > { %vm606_vm12 = vcmp.eq.s32.totalorder %v1098_v37, %v604_v4 }
  0xcd   : > { %v785_v12 = vsel %vm606_vm12, 1.0, %v849_v43 }
 0x12a   : > { %v400_v15 = vpop.f32.mrf.mxu1 }
 0x12b   : > { %v441_v16 = vmul.f32 %v400_v15, %v400_v15  ;;  %v639_v15 = vadd.f32 %v788_v10, %v625_v6 }
 0x12d   : > { %497 = vmatmul.f32.vlgmr.msra.gmra.mxu3 %v441_v16  ;;  %v612_v16 = vadd.f32 %v785_v12, %v598_v9 }
 0x130   : > { %v429_v17 = vpop.f32.mrf.mxu2 }
 0x131   : > { %v442_v18 = vmul.f32 %v429_v17, %v429_v17 }
 0x132   : > { %v403_v19 = vpop.f32.mrf.mxu1 }
 0x133   : > { %v443_v20 = vmul.f32 %v403_v19, %v403_v19  ;;  %526 = vmatmul.f32.vlgmr.msrb.gmra.mxu1 %v442_v18  ;;  %v790_v18 = vsel %vm647_vm13, 1.0, %v849_v43  ;;  %v787_v19 = vsel %vm620_vm14, 1.0, %v849_v43 }
 0x135   : > { %500 = vmatmul.f32.gmra.mxu3 %v443_v20 }
 0x138   : > { %v432_v21 = vpop.f32.mrf.mxu2 }
 0x139   : > { %v444_v22 = vmul.f32 %v432_v21, %v432_v21  ;;  %v646_v21 = vpop.permute.xlu2 %645 }
 0x13a   : > { %v406_v23 = vpop.f32.mrf.mxu1  ;;  %vm648_vm1 = vcmp.eq.s32.totalorder %v1098_v37, %v646_v21 }
 0x13b   : > { %v445_v24 = vmul.f32 %v406_v23, %v406_v23  ;;  %529 = vmatmul.f32.gmra.mxu1 %v444_v22  ;;  %v653_v22 = vadd.f32 %v790_v18, %v639_v15  ;;  %v626_v23 = vadd.f32 %v787_v19, %v612_v16 }
 0x13d   : > { %503 = vmatmul.f32.gmra.mxu3 %v445_v24  ;;  %v789_v24 = vsel %vm634_vm15, 1.0, %v849_v43 }
 0x140   : > { %v435_v25 = vpop.f32.mrf.mxu2 }
 0x141   : > { %v446_v26 = vmul.f32 %v435_v25, %v435_v25  ;;  %v640_v25 = vadd.f32 %v789_v24, %v626_v23 }
 0x142   : > { %v409_v27 = vpop.f32.mrf.mxu1 }
 0x143   : > { %v447_v28 = vmul.f32 %v409_v27, %v409_v27  ;;  %532 = vmatmul.f32.gmra.mxu1 %v446_v26  ;;  %v791_v26 = vsel %vm648_vm1, 1.0, %v849_v43 }
 0x144   : > { %v654_v27 = vadd.f32 %v791_v26, %v640_v25 }
 0x145   : > { %506 = vmatmul.f32.gmra.mxu3 %v447_v28  ;;  %v831_v28 = vld [vmem:[%s1152_s6] ss:$0 sm:$0xff] }
 0x148   : > { %v438_v29 = vpop.f32.mrf.mxu2 }
 0x149   : > { %v448_v30 = vmul.f32 %v438_v29, %v438_v29 }
 0x14b   : > { %535 = vmatmul.f32.gmra.mxu1 %v448_v30 }
 0x1b0   : > { %v498_v40 = vpop.f32.mrf.mxu3  ;;  %v527_v41 = vpop.f32.mrf.mxu1 }
 0x1b1   : > { %v528_v20 = vadd.f32 %v527_v41, %v498_v40 }
 0x1b8   : > { %v501_v46 = vpop.f32.mrf.mxu3  ;;  %v530_v47 = vpop.f32.mrf.mxu1 }
 0x1b9   : > { %v531_v17 = vadd.f32 %v530_v47, %v501_v46 }
 0x1c0   : > { %v504_v59 = vpop.f32.mrf.mxu3  ;;  %v533_v60 = vpop.f32.mrf.mxu1 }
 0x1c1   : > { %v534_v13 = vadd.f32 %v533_v60, %v504_v59 }
 0x1c8   : > { %v507_v7 = vpop.f32.mrf.mxu3  ;;  %v536_v8 = vpop.f32.mrf.mxu1 }
 0x1c9   : > { %v537_v11 = vadd.f32 %v536_v8, %v507_v7 }
 0x1cb   : > { %674 = vmatpush.msrb.mxu2 %v537_v11 }
 0x1cd   : > { %675 = vmatpush.msrb.mxu2 %v534_v13 }
 0x1cf   : > { %676 = vmatpush.msrb.mxu2 %v531_v17 }
 0x1d1   : > { %677 = vmatpush.msrb.mxu2 %v528_v20 }
 0x1d2   : > { %792 = vmatmul.msk.f32.vlgmr.msrb.gmra.mxu2 %vm655_vm0, %v653_v22 }
 0x1da   : > { %793 = vmatmul.msk.f32.gmra.mxu2 %vm655_vm0, %v654_v27 }
 0x255   : > { %v679_v29 = vpop.f32.mrf.mxu2 }
 0x256   : > { %v685_v30 = vmul.f32 0.015625, %v679_v29 }
 0x258   : > { %v691_v32 = vmul.f32 %v831_v28, %v685_v30 }
 0x25a   : > { %v697_v33 = vadd.f32 %v832_v31, %v691_v32 }
 0x25c   : > { %v699_v34 = vmax.f32 %v697_v33, 0.0 }
 0x25d   : > { %v682_v35 = vpop.f32.mrf.mxu2 }
 0x25e   : > { %701 = vst [vmem:[%s307_s12] sm:$0xff] %v699_v34  ;;  %v686_v36 = vmul.f32 0.015625, %v682_v35 }
 0x260   : > { %v692_v37 = vmul.f32 %v831_v28, %v686_v36 }
 0x262   : > { %v698_v38 = vadd.f32 %v832_v31, %v692_v37 }
 0x264   : > { %v700_v39 = vmax.f32 %v698_v38, 0.0 }
 0x266   : > { %702 = vst [vmem:[%s307_s12 + $0x8] sm:$0xff] %v700_v39 }
 0x267 PF: > { %s18_s27 = sadd.s32 1, %s839_s27  }
 0x268   : > { %p15_p4 = scmp.ge.s32.totalorder %s18_s27, 4  }
 0x26a   :  { %17 = sbr.rel (!%p15_p4) target bundleno = 1 (0x1), region = 82 }

</bundles_post_ra>
